<compile_context>
chip_gen: v7x
topology: tpu7x:2x2x1
jax: 0.10.0
libtpu: 0.0.40
codegen_flags: <defaults>
</compile_context>

<pallas_src>
import functools

import jax
import jax.numpy as jnp
from jax.experimental import pallas as pl
from jax.experimental.pallas import tpu as pltpu

LOG_STD_MIN, LOG_STD_MAX = -10.0, 2.0
_LS_SCALE = 0.5 * (LOG_STD_MAX - LOG_STD_MIN)      # 6.0
_LS_SHIFT = LOG_STD_MIN + _LS_SCALE                # -4.0


def _round_up(x, m):
    return ((x + m - 1) // m) * m


def actor_kernel(s_ref, w1_ref, b1_ref, w2_ref, b2_ref, w3_ref, b3_ref,
                 mmask_ref, smask_ref, out_ref):
    """One batch tile: 3 MXU matmuls + ReLU + head post-processing.

    Output column layout (lane-dense slab):
      [0, A)      -> mean
      [A, 2A)     -> sd
      [2A, OUT)   -> 0 (masked out; wrapper slices anyway)
    """
    w_dtype = w1_ref.dtype                      # bf16 fast path or f32
    s = s_ref[...].astype(w_dtype)
    h1 = jnp.dot(s, w1_ref[...], preferred_element_type=jnp.float32) + b1_ref[...]
    h1 = jnp.maximum(h1, 0.0)
    h2 = jnp.dot(h1.astype(w_dtype), w2_ref[...],
                 preferred_element_type=jnp.float32) + b2_ref[...]
    h2 = jnp.maximum(h2, 0.0)
    # fused head: (TILE_B, H) @ (H, OUT), OUT is a 256-multiple (single MXU pass)
    head = jnp.dot(h2.astype(w_dtype), w3_ref[...],
                   preferred_element_type=jnp.float32) + b3_ref[...]
    # log_std -> tanh -> affine [-10, 2] folded into 6*t - 4 -> exp (EUP path)
    sd = jnp.exp(_LS_SCALE * jnp.tanh(head) + _LS_SHIFT)
    # select via precomputed resident masks (no per-step iota/compare)
    out_ref[...] = head * mmask_ref[...] + sd * smask_ref[...]


def _resident(shape):
    """VMEM-resident block: constant index_map + single buffer."""
    return pl.BlockSpec(shape, lambda i: (0, 0), pipeline_mode=pl.Buffered(1))


@functools.partial(jax.jit, static_argnames=("action_dims", "min_kernel_batch"))
def actor_continuous_forward(s, w1, b1, w2, b2, w3, b3, *, action_dims,
                             min_kernel_batch=64):
    """Pallas forward. Weights are the *prepared* (padded) parameters."""
    B, in_dims = s.shape
    IN = w1.shape[0]           # padded input dim (multiple of 128)
    H = w1.shape[1]            # padded hidden (multiple of 256)
    OUT = w3.shape[1]          # padded head width (multiple of 256)
    w_dtype = w1.dtype

    if in_dims != IN:          # lane-align the streamed s tile / first K dim
        s = jnp.pad(s, ((0, 0), (0, IN - in_dims)))

    if B < min_kernel_batch:
        # Interactive / per-env stepping regime: a single-grid-step pallas_call
        # is pure launch + pipeline-prime overhead; a fused XLA expression wins.
        h1 = jnp.maximum(jnp.dot(s.astype(w_dtype), w1,
                                 preferred_element_type=jnp.float32) + b1, 0.0)
        h2 = jnp.maximum(jnp.dot(h1.astype(w_dtype), w2,
                                 preferred_element_type=jnp.float32) + b2, 0.0)
        head = jnp.dot(h2.astype(w_dtype), w3,
                       preferred_element_type=jnp.float32) + b3
        m = head[:, :action_dims]
        sd = jnp.exp(_LS_SCALE * jnp.tanh(head[:, action_dims:2 * action_dims])
                     + _LS_SHIFT)
        return m, sd

    # ---- batch tiling --------------------------------------------------
    # Big tiles amortize the ~0.35 us/step pipeline overhead (measured sweeps
    # hit ~85% of roofline at 512 vs ~29% at 128). If the whole batch would fit
    # in one 512-row step, split into 2x256 so v7x's two TensorCores both work.
    tile_b = min(512, _round_up(B, 8))
    if tile_b >= 512 and _round_up(B, tile_b) // tile_b < 2:
        tile_b = 256
    b_pad = _round_up(B, tile_b)
    if b_pad != B:
        s = jnp.pad(s, ((0, b_pad - B), (0, 0)))
    grid = (b_pad // tile_b,)

    # ---- resident column masks (mean lanes / sd lanes) ------------------
    col = jnp.arange(OUT)
    mean_mask = (col < action_dims).astype(jnp.float32)[None, :]
    sd_mask = ((col >= action_dims) & (col < 2 * action_dims)
               ).astype(jnp.float32)[None, :]

    # ---- cost estimate & VMEM budget ------------------------------------
    flops = 2 * b_pad * (IN * H + H * H + H * OUT)
    transcendentals = 2 * b_pad * OUT                       # tanh + exp
    w_itemsize = int(jnp.dtype(w_dtype).itemsize)
    weight_bytes = (IN * H + H * H + H * OUT) * w_itemsize + (2 * H + 3 * OUT) * 4
    bytes_accessed = b_pad * IN * 4 + b_pad * OUT * 4 + weight_bytes
    cost = pl.CostEstimate(flops=flops, transcendentals=transcendentals,
                           bytes_accessed=bytes_accessed)
    stream_bytes = 2 * (tile_b * IN * 4 + tile_b * OUT * 4)  # double-buffered tiles
    scratch_bytes = 4 * tile_b * H * 4                       # h1/h2 + headroom
    vmem_limit = int(min(128 << 20,
                         max(32 << 20,
                             2 * (weight_bytes + stream_bytes + scratch_bytes))))

    res = pl.pallas_call(
        actor_kernel,
        out_shape=jax.ShapeDtypeStruct((b_pad, OUT), jnp.float32),
        grid=grid,
        in_specs=[
            pl.BlockSpec((tile_b, IN), lambda i: (i, 0)),    # streamed s tile
            _resident((IN, H)),                              # W1 (single-buffered)
            _resident((1, H)),                               # b1
            _resident((H, H)),                               # W2
            _resident((1, H)),                               # b2
            _resident((H, OUT)),                             # W3 (fused head)
            _resident((1, OUT)),                             # b3
            _resident((1, OUT)),                             # mean lane mask
            _resident((1, OUT)),                             # sd lane mask
        ],
        out_specs=pl.BlockSpec((tile_b, OUT), lambda i: (i, 0)),  # lane-dense slab
        compiler_params=pltpu.CompilerParams(
            dimension_semantics=("parallel",),               # megacore / v7x 2-TC
            vmem_limit_bytes=vmem_limit),
        cost_estimate=cost,
    )(s, w1, b1, w2, b2, w3, b3, mean_mask, sd_mask)

    m = res[:B, :action_dims]
    sd = res[:B, action_dims:2 * action_dims]
    return m, sd


# ----------------------------- parameters ----------------------------------
def orthogonal(key, shape):
    """Deterministic orthogonal init (same spirit as nn.init.orthogonal_)."""
    n, m = shape
    a = jax.random.normal(key, (max(n, m), min(n, m)), dtype=jnp.float32)
    q, r = jnp.linalg.qr(a)
    q = q * jnp.sign(jnp.diagonal(r))
    if n < m:
        q = q.T
    return q[:n, :m].astype(jnp.float32)


def make_params(key, input_dims, action_dims, hidden_dims):
    """Raw params, PyTorch semantics; stored transposed as (in, out)/(1, out)."""
    k1, k2, k3 = jax.random.split(key, 3)
    w1 = orthogonal(k1, (hidden_dims, input_dims)).T
    b1 = jnp.zeros((1, hidden_dims), jnp.float32)
    w2 = orthogonal(k2, (hidden_dims, hidden_dims)).T
    b2 = jnp.zeros((1, hidden_dims), jnp.float32)
    w3 = orthogonal(k3, (action_dims * 2, hidden_dims)).T      # (hidden, 2A)
    b3 = jnp.zeros((1, action_dims * 2), jnp.float32)
    return w1, b1, w2, b2, w3, b3


def prepare_params(params, *, weight_dtype=jnp.bfloat16):
    """Zero-pad dims once, outside jit.

    in_dims -> 128-multiple (lane-aligned streamed s / K of first matmul);
    hidden & head -> 256-multiples (fills the 256-wide MXU on v6e/v7x; v5e's
    128x128 MXU is already matched).  Weights default to bf16 (MXU-native,
    halves resident VMEM); biases and all elementwise math stay f32 on every
    generation.  Pass weight_dtype=jnp.float32 for the strict-accuracy path.
    """
    w1, b1, w2, b2, w3, b3 = params
    IN, H = w1.shape
    OUT = w3.shape[1]
    INp, Hp, OUTp = _round_up(IN, 128), _round_up(H, 256), _round_up(OUT, 256)
    w1 = jnp.pad(w1, ((0, INp - IN), (0, Hp - H))).astype(weight_dtype)
    b1 = jnp.pad(b1, ((0, 0), (0, Hp - H)))
    w2 = jnp.pad(w2, ((0, Hp - H), (0, Hp - H))).astype(weight_dtype)
    b2 = jnp.pad(b2, ((0, 0), (0, Hp - H)))
    w3 = jnp.pad(w3, ((0, Hp - H), (0, OUTp - OUT))).astype(weight_dtype)
    b3 = jnp.pad(b3, ((0, 0), (0, OUTp - OUT)))
    return w1, b1, w2, b2, w3, b3


def reference_forward(s, params, action_dims):
    """Pure-JAX reference matching the PyTorch module (unpadded f32 params)."""
    w1, b1, w2, b2, w3, b3 = params
    h1 = jnp.maximum(s @ w1 + b1, 0.0)
    h2 = jnp.maximum(h1 @ w2 + b2, 0.0)
    head = h2 @ w3 + b3
    m, log_std = head[:, :action_dims], head[:, action_dims:]
    log_std = jnp.tanh(log_std)
    log_std = LOG_STD_MIN + 0.5 * (LOG_STD_MAX - LOG_STD_MIN) * (log_std + 1.0)
    return m, jnp.exp(log_std)


if __name__ == "__main__":
    batch = 2
    input_dims = 16
    action_dims = 4
    hidden_dims = 32

    key = jax.random.PRNGKey(0)
    k_params, k_input = jax.random.split(key)
    raw_params = make_params(k_params, input_dims, action_dims, hidden_dims)
    s = jax.random.normal(k_input, (batch, input_dims), dtype=jnp.float32)

    # ---- f32 weight path: strict check against the PyTorch-equivalent reference
    p_f32 = prepare_params(raw_params, weight_dtype=jnp.float32)
    m, sd = actor_continuous_forward(s, *p_f32, action_dims=action_dims,
                                     min_kernel_batch=0)   # force the Pallas kernel
    jax.block_until_ready((m, sd))
    m_ref, sd_ref = reference_forward(s, raw_params, action_dims)
    assert m.shape == (batch, action_dims) and sd.shape == (batch, action_dims)
    assert jnp.allclose(m, m_ref, atol=1e-5, rtol=1e-5)
    assert jnp.allclose(sd, sd_ref, atol=1e-5, rtol=1e-5)

    # ---- bf16 fast path (default prepare): kernel vs identically-quantized XLA
    p_bf16 = prepare_params(raw_params)
    m_k, sd_k = actor_continuous_forward(s, *p_bf16, action_dims=action_dims,
                                         min_kernel_batch=0)       # Pallas kernel
    m_x, sd_x = actor_continuous_forward(s, *p_bf16, action_dims=action_dims,
                                         min_kernel_batch=1 << 20)  # XLA fallback
    jax.block_until_ready((m_k, sd_k, m_x, sd_x))
    assert jnp.allclose(m_k, m_x, atol=1e-3, rtol=1e-3)
    assert jnp.allclose(sd_k, sd_x, atol=1e-3, rtol=1e-3)

    print("KERNEL_OK")
</pallas_src>

<mosaic_0001>
module attributes {stable_mosaic.version = 11 : i64} {
  func.func @actor_kernel(%arg0: i32, %arg1: memref<8x128xf32, #tpu.memory_space<vmem>>, %arg2: memref<128x256xf32, #tpu.memory_space<vmem>>, %arg3: memref<1x256xf32, #tpu.memory_space<vmem>>, %arg4: memref<256x256xf32, #tpu.memory_space<vmem>>, %arg5: memref<1x256xf32, #tpu.memory_space<vmem>>, %arg6: memref<256x256xf32, #tpu.memory_space<vmem>>, %arg7: memref<1x256xf32, #tpu.memory_space<vmem>>, %arg8: memref<1x256xf32, #tpu.memory_space<vmem>>, %arg9: memref<1x256xf32, #tpu.memory_space<vmem>>, %arg10: memref<8x256xf32, #tpu.memory_space<vmem>>) attributes {dimension_semantics = [#tpu.dimension_semantics<parallel>], iteration_bounds = array<i64: 1>, scalar_prefetch = 0 : i64, scratch_operands = 0 : i64, tpu.core_type = #tpu.core_type<tc>, window_params = [{transform_indices = @transform_0, window_bounds = array<i64: 8, 128>}, {pipeline_mode = #tpu.pipeline_mode<synchronous>, transform_indices = @transform_1, window_bounds = array<i64: 128, 256>}, {pipeline_mode = #tpu.pipeline_mode<synchronous>, transform_indices = @transform_2, window_bounds = array<i64: 1, 256>}, {pipeline_mode = #tpu.pipeline_mode<synchronous>, transform_indices = @transform_3, window_bounds = array<i64: 256, 256>}, {pipeline_mode = #tpu.pipeline_mode<synchronous>, transform_indices = @transform_4, window_bounds = array<i64: 1, 256>}, {pipeline_mode = #tpu.pipeline_mode<synchronous>, transform_indices = @transform_5, window_bounds = array<i64: 256, 256>}, {pipeline_mode = #tpu.pipeline_mode<synchronous>, transform_indices = @transform_6, window_bounds = array<i64: 1, 256>}, {pipeline_mode = #tpu.pipeline_mode<synchronous>, transform_indices = @transform_7, window_bounds = array<i64: 1, 256>}, {pipeline_mode = #tpu.pipeline_mode<synchronous>, transform_indices = @transform_8, window_bounds = array<i64: 1, 256>}, {transform_indices = @transform_9, window_bounds = array<i64: 8, 256>}]} {
    %c0 = arith.constant 0 : index
    %c0_0 = arith.constant 0 : index
    %0 = vector.load %arg1[%c0, %c0_0] : memref<8x128xf32, #tpu.memory_space<vmem>>, vector<8x128xf32>
    %c0_1 = arith.constant 0 : index
    %c0_2 = arith.constant 0 : index
    %1 = vector.load %arg2[%c0_1, %c0_2] : memref<128x256xf32, #tpu.memory_space<vmem>>, vector<128x256xf32>
    %cst = arith.constant dense<0.000000e+00> : vector<8x256xf32>
    %2 = tpu.matmul %0, %1, %cst {dimension_numbers = #tpu.dot_dimension_numbers<[1], [0], [0], [1], [0, 0, 1, 1], [], []>} : vector<8x128xf32>, vector<128x256xf32>, vector<8x256xf32> -> vector<8x256xf32>
    %c0_3 = arith.constant 0 : index
    %c0_4 = arith.constant 0 : index
    %3 = vector.load %arg3[%c0_3, %c0_4] : memref<1x256xf32, #tpu.memory_space<vmem>>, vector<1x256xf32>
    %4 = vector.broadcast %3 : vector<1x256xf32> to vector<8x256xf32>
    %5 = arith.addf %2, %4 : vector<8x256xf32>
    %cst_5 = arith.constant 0.000000e+00 : f32
    %6 = vector.broadcast %cst_5 : f32 to vector<8x256xf32>
    %7 = arith.maximumf %5, %6 : vector<8x256xf32>
    %c0_6 = arith.constant 0 : index
    %c0_7 = arith.constant 0 : index
    %8 = vector.load %arg4[%c0_6, %c0_7] : memref<256x256xf32, #tpu.memory_space<vmem>>, vector<256x256xf32>
    %cst_8 = arith.constant dense<0.000000e+00> : vector<8x256xf32>
    %9 = tpu.matmul %7, %8, %cst_8 {dimension_numbers = #tpu.dot_dimension_numbers<[1], [0], [0], [1], [0, 0, 1, 1], [], []>} : vector<8x256xf32>, vector<256x256xf32>, vector<8x256xf32> -> vector<8x256xf32>
    %c0_9 = arith.constant 0 : index
    %c0_10 = arith.constant 0 : index
    %10 = vector.load %arg5[%c0_9, %c0_10] : memref<1x256xf32, #tpu.memory_space<vmem>>, vector<1x256xf32>
    %11 = vector.broadcast %10 : vector<1x256xf32> to vector<8x256xf32>
    %12 = arith.addf %9, %11 : vector<8x256xf32>
    %cst_11 = arith.constant 0.000000e+00 : f32
    %13 = vector.broadcast %cst_11 : f32 to vector<8x256xf32>
    %14 = arith.maximumf %12, %13 : vector<8x256xf32>
    %c0_12 = arith.constant 0 : index
    %c0_13 = arith.constant 0 : index
    %15 = vector.load %arg6[%c0_12, %c0_13] : memref<256x256xf32, #tpu.memory_space<vmem>>, vector<256x256xf32>
    %cst_14 = arith.constant dense<0.000000e+00> : vector<8x256xf32>
    %16 = tpu.matmul %14, %15, %cst_14 {dimension_numbers = #tpu.dot_dimension_numbers<[1], [0], [0], [1], [0, 0, 1, 1], [], []>} : vector<8x256xf32>, vector<256x256xf32>, vector<8x256xf32> -> vector<8x256xf32>
    %c0_15 = arith.constant 0 : index
    %c0_16 = arith.constant 0 : index
    %17 = vector.load %arg7[%c0_15, %c0_16] : memref<1x256xf32, #tpu.memory_space<vmem>>, vector<1x256xf32>
    %18 = vector.broadcast %17 : vector<1x256xf32> to vector<8x256xf32>
    %19 = arith.addf %16, %18 : vector<8x256xf32>
    %20 = math.tanh %19 : vector<8x256xf32>
    %cst_17 = arith.constant 6.000000e+00 : f32
    %21 = vector.broadcast %cst_17 : f32 to vector<8x256xf32>
    %22 = arith.mulf %21, %20 : vector<8x256xf32>
    %cst_18 = arith.constant -4.000000e+00 : f32
    %23 = vector.broadcast %cst_18 : f32 to vector<8x256xf32>
    %24 = arith.addf %22, %23 : vector<8x256xf32>
    %25 = math.exp %24 : vector<8x256xf32>
    %c0_19 = arith.constant 0 : index
    %c0_20 = arith.constant 0 : index
    %26 = vector.load %arg8[%c0_19, %c0_20] : memref<1x256xf32, #tpu.memory_space<vmem>>, vector<1x256xf32>
    %27 = vector.broadcast %26 : vector<1x256xf32> to vector<8x256xf32>
    %28 = arith.mulf %19, %27 : vector<8x256xf32>
    %c0_21 = arith.constant 0 : index
    %c0_22 = arith.constant 0 : index
    %29 = vector.load %arg9[%c0_21, %c0_22] : memref<1x256xf32, #tpu.memory_space<vmem>>, vector<1x256xf32>
    %30 = vector.broadcast %29 : vector<1x256xf32> to vector<8x256xf32>
    %31 = arith.mulf %25, %30 : vector<8x256xf32>
    %32 = arith.addf %28, %31 : vector<8x256xf32>
    %c0_23 = arith.constant 0 : index
    %c0_24 = arith.constant 0 : index
    %33 = vector.load %arg10[%c0_23, %c0_24] : memref<8x256xf32, #tpu.memory_space<vmem>>, vector<8x256xf32>
    tpu.vector_store %arg10[%c0_23, %c0_24], %32 {strides = array<i32>} : memref<8x256xf32, #tpu.memory_space<vmem>>, vector<8x256xf32>,
    return
  }
  func.func @transform_0(%arg0: i32) -> (i32, i32) {
    %c0_i32 = arith.constant 0 : i32
    %c0_i32_0 = arith.constant 0 : i32
    return %arg0, %c0_i32 : i32, i32
  }
  func.func @transform_1(%arg0: i32) -> (i32, i32) {
    %c0_i32 = arith.constant 0 : i32
    %c0_i32_0 = arith.constant 0 : i32
    %c0_i32_1 = arith.constant 0 : i32
    return %c0_i32, %c0_i32_0 : i32, i32
  }
  func.func @transform_2(%arg0: i32) -> (i32, i32) {
    %c0_i32 = arith.constant 0 : i32
    %c0_i32_0 = arith.constant 0 : i32
    %c0_i32_1 = arith.constant 0 : i32
    return %c0_i32, %c0_i32_0 : i32, i32
  }
  func.func @transform_3(%arg0: i32) -> (i32, i32) {
    %c0_i32 = arith.constant 0 : i32
    %c0_i32_0 = arith.constant 0 : i32
    %c0_i32_1 = arith.constant 0 : i32
    return %c0_i32, %c0_i32_0 : i32, i32
  }
  func.func @transform_4(%arg0: i32) -> (i32, i32) {
    %c0_i32 = arith.constant 0 : i32
    %c0_i32_0 = arith.constant 0 : i32
    %c0_i32_1 = arith.constant 0 : i32
    return %c0_i32, %c0_i32_0 : i32, i32
  }
  func.func @transform_5(%arg0: i32) -> (i32, i32) {
    %c0_i32 = arith.constant 0 : i32
    %c0_i32_0 = arith.constant 0 : i32
    %c0_i32_1 = arith.constant 0 : i32
    return %c0_i32, %c0_i32_0 : i32, i32
  }
  func.func @transform_6(%arg0: i32) -> (i32, i32) {
    %c0_i32 = arith.constant 0 : i32
    %c0_i32_0 = arith.constant 0 : i32
    %c0_i32_1 = arith.constant 0 : i32
    return %c0_i32, %c0_i32_0 : i32, i32
  }
  func.func @transform_7(%arg0: i32) -> (i32, i32) {
    %c0_i32 = arith.constant 0 : i32
    %c0_i32_0 = arith.constant 0 : i32
    %c0_i32_1 = arith.constant 0 : i32
    return %c0_i32, %c0_i32_0 : i32, i32
  }
  func.func @transform_8(%arg0: i32) -> (i32, i32) {
    %c0_i32 = arith.constant 0 : i32
    %c0_i32_0 = arith.constant 0 : i32
    %c0_i32_1 = arith.constant 0 : i32
    return %c0_i32, %c0_i32_0 : i32, i32
  }
  func.func @transform_9(%arg0: i32) -> (i32, i32) {
    %c0_i32 = arith.constant 0 : i32
    %c0_i32_0 = arith.constant 0 : i32
    return %arg0, %c0_i32 : i32, i32
  }
}

</mosaic_0001>

<bundles_post_ra>
// kernel: actor_continuous_forward.1
= control target key start
LH: loop header
LB: loop body
LE: loop exit
PB: predicated region body
PF: predicated region fallthrough
CT: control target
= control target key end

     0   :  { %14 = vsyncpa [#allocation3], 0  ;;  %s925_s0 = inlined_call_operand.vmem [shape: f32[8,128], index: 0, kind: input, shape index: {}]   ;;  %s926_s1 = inlined_call_operand.hbm [shape: f32[128,256], index: 1, kind: input, shape index: {}]   ;;  %s927_s2 = inlined_call_operand.vmem [shape: f32[1,256], index: 2, kind: input, shape index: {}]   ;;  %s928_s3 = inlined_call_operand.hbm [shape: f32[256,256], index: 3, kind: input, shape index: {}]   ;;  %s929_s4 = inlined_call_operand.vmem [shape: f32[1,256], index: 4, kind: input, shape index: {}]   ;;  %s930_s5 = inlined_call_operand.hbm [shape: f32[256,256], index: 5, kind: input, shape index: {}]   ;;  %s931_s6 = inlined_call_operand.vmem [shape: f32[1,256], index: 6, kind: input, shape index: {}]   ;;  %s932_s7 = inlined_call_operand.vmem [shape: f32[1,256], index: 7, kind: input, shape index: {}]   ;;  %s933_s8 = inlined_call_operand.vmem [shape: f32[1,256], index: 8, kind: input, shape index: {}]   ;;  %s934_s9 = inlined_call_operand.vmem [shape: f32[8,256], index: 9, kind: output, shape index: {}]  }
   0x1   :  { %15 = vsyncpa [#allocation5], 0  ;;  %s779_s30 = smov [#allocation4]   ;;  %s780_s11 = smov [#allocation2]  }
   0x2   :  { %s37_s10 = sshll.u32 %s779_s30, 4  ;;  %s23_s12 = sshll.u32 %s780_s11, 4  ;;  %s38_s10 = int_to_ptr.vmem [resolvable:$true] %s37_s10  ;;  %s835_s12 = int_to_ptr.vmem [resolvable:$true] %s23_s12 }
   0x3   :  { %s709_s15 = scalar_lea.hbm %s928_s3, 8192 }
   0x4   :  { %p710_p0 = scmp.ne.s32.totalorder %s928_s3, %s709_s15  ;;  %p713_p1 = scmp.lt.u32.totalorder %s709_s15, %s928_s3 }
   0x6   :  { %p715_p2 = pnand %p713_p1, %p710_p0 }
   0x8   :  { %718 = shalt.err (!%p715_p2)
}
   0x9   :  { %s719_s20 = scalar_lea.vmem %s38_s10, 8192  ;;  %p724_p4 = scmp.lt.s32.totalorder %s38_s10, %s38_s10 }
   0xa   :  { %p720_p3 = scmp.ne.s32.totalorder %s38_s10, %s719_s20  ;;  %p725_p5 = scmp.lt.s32.totalorder %s719_s20, %s719_s20 }
   0xc   :  { %p726_p6 = por %p725_p5, %p724_p4 }
   0xe   :  { %p727_p7 = pnand %p726_p6, %p720_p3 }
  0x10   :  { %730 = shalt.err (!%p727_p7)
}
  0x11   :  { %s781_s21 = smov 256   ;;  %s782_s22 = smov 16  }
  0x12   :  { %43 = dma.hbm_to_vmem [thread:$0]  %s928_s3, 8192, %s38_s10, [#allocation5], %s781_s21, %s781_s21, %s782_s22  }
  0x13   :  { %s731_s27 = scalar_lea.hbm %s926_s1, 4096 }
  0x14   :  { %p732_p8 = scmp.ne.s32.totalorder %s926_s1, %s731_s27  ;;  %p735_p9 = scmp.lt.u32.totalorder %s731_s27, %s926_s1 }
  0x16   :  { %p737_p10 = pnand %p735_p9, %p732_p8 }
  0x18   :  { %740 = shalt.err (!%p737_p10)
}
  0x19   :  { %s741_s13 = scalar_lea.vmem %s835_s12, 4096  ;;  %p746_p12 = scmp.lt.s32.totalorder %s835_s12, %s835_s12 }
  0x1a   :  { %p742_p11 = scmp.ne.s32.totalorder %s835_s12, %s741_s13  ;;  %p747_p13 = scmp.lt.s32.totalorder %s741_s13, %s741_s13 }
  0x1c   :  { %p748_p0 = por %p747_p13, %p746_p12 }
  0x1e   :  { %p749_p1 = pnand %p748_p0, %p742_p11 }
  0x20   :  { %752 = shalt.err (!%p749_p1)
}
  0x21   :  { %29 = dma.hbm_to_vmem [thread:$0]  %s926_s1, 4096, %s835_s12, [#allocation3], %s781_s21, %s781_s21, %s782_s22  }
  0x22   :  { %s783_s14 = smov [#allocation6]   ;;  %s753_s18 = scalar_lea.hbm %s930_s5, 8192 }
  0x23   :  { %s51_s15 = sshll.u32 %s783_s14, 4  ;;  %p754_p2 = scmp.ne.s32.totalorder %s930_s5, %s753_s18  ;;  %s52_s15 = int_to_ptr.vmem [resolvable:$true] %s51_s15 }
  0x24   :  { %p757_p3 = scmp.lt.u32.totalorder %s753_s18, %s930_s5 }
  0x26   :  { %p759_p4 = pnand %p757_p3, %p754_p2 }
  0x28   :  { %762 = shalt.err (!%p759_p4)
}
  0x29   :  { %s763_s25 = scalar_lea.vmem %s52_s15, 8192  ;;  %p768_p6 = scmp.lt.s32.totalorder %s52_s15, %s52_s15 }
  0x2a   :  { %p764_p5 = scmp.ne.s32.totalorder %s52_s15, %s763_s25  ;;  %p769_p7 = scmp.lt.s32.totalorder %s763_s25, %s763_s25 }
  0x2c   :  { %p770_p8 = por %p769_p7, %p768_p6 }
  0x2e   :  { %p771_p9 = pnand %p770_p8, %p764_p5 }
  0x30   :  { %774 = shalt.err (!%p771_p9)
}
  0x31   :  { %57 = dma.hbm_to_vmem [thread:$0]  %s930_s5, 8192, %s52_s15, [#allocation5], %s781_s21, %s781_s21, %s782_s22  }
  0x32   :  { %775 = dma.done.wait [#allocation3], 4096  }
  0x33   :  { %776 = vsyncadd [#allocation3], 4294963200 }
  0x34   :  { %777 = dma.done.wait [#allocation5], 16384  }
  0x35   :  { %778 = vsyncadd [#allocation5], 4294950912  ;;  %v784_v0 = vmov 0.0   ;;  %v75_v1 = vld [vmem:[#allocation2 + $0x8] sm:$0xff]  ;;  %v77_v2 = vld [vmem:[#allocation2 + $0x18] sm:$0xff] }
  0x36   :  { %182 = vmatprep.mubr.f32.mxu0 %v784_v0  ;;  %v74_v3 = vld [vmem:[#allocation2] sm:$0xff]  ;;  %v535_v4 = vpack.c.bf16 %v77_v2, %v75_v1  ;;  %v76_v5 = vld [vmem:[#allocation2 + $0x10] sm:$0xff]  ;;  %v79_v6 = vld [vmem:[#allocation2 + $0x28] sm:$0xff] }
  0x37   :  { %v81_v7 = vld [vmem:[#allocation2 + $0x38] sm:$0xff]  ;;  %v537_v8 = vpack.c.bf16 %v76_v5, %v74_v3  ;;  %v78_v10 = vld [vmem:[#allocation2 + $0x20] sm:$0xff]  ;;  %v80_v11 = vld [vmem:[#allocation2 + $0x30] sm:$0xff] }
  0x38   :  { %v539_v9 = vpack.c.bf16 %v81_v7, %v79_v6  ;;  %v83_v12 = vld [vmem:[#allocation2 + $0x48] sm:$0xff]  ;;  %536 = vmatprep.subr.bf16.mxu0 %v535_v4  ;;  %v85_v13 = vld [vmem:[#allocation2 + $0x58] sm:$0xff]  ;;  %v541_v14 = vpack.c.bf16 %v80_v11, %v78_v10  ;;  %v82_v16 = vld [vmem:[#allocation2 + $0x40] sm:$0xff] }
  0x39   :  { %538 = vmatpush1.bf16.msra.mxu0 %v537_v8  ;;  %v543_v15 = vpack.c.bf16 %v85_v13, %v83_v12  ;;  %v84_v17 = vld [vmem:[#allocation2 + $0x50] sm:$0xff]  ;;  %v87_v18 = vld [vmem:[#allocation2 + $0x68] sm:$0xff]  ;;  %v89_v19 = vld [vmem:[#allocation2 + $0x78] sm:$0xff] }
  0x3a   :  { %540 = vmatprep.subr.bf16.mxu0 %v539_v9  ;;  %v545_v20 = vpack.c.bf16 %v84_v17, %v82_v16  ;;  %v547_v21 = vpack.c.bf16 %v89_v19, %v87_v18  ;;  %v86_v22 = vld [vmem:[#allocation2 + $0x60] sm:$0xff]  ;;  %v88_v23 = vld [vmem:[#allocation2 + $0x70] sm:$0xff]  ;;  %v91_v24 = vld [vmem:[#allocation2 + $0x88] sm:$0xff] }
  0x3b   :  { %v93_v25 = vld [vmem:[#allocation2 + $0x98] sm:$0xff]  ;;  %v90_v26 = vld [vmem:[#allocation2 + $0x80] sm:$0xff]  ;;  %v92_v27 = vld [vmem:[#allocation2 + $0x90] sm:$0xff]  ;;  %v549_v31 = vpack.c.bf16 %v88_v23, %v86_v22 }
  0x3c   :  { %v192_v28 = vld [vmem:[#allocation4 + $0x8] sm:$0xff]  ;;  %v194_v29 = vld [vmem:[#allocation4 + $0x18] sm:$0xff]  ;;  %v191_v30 = vld [vmem:[#allocation4] sm:$0xff]  ;;  %v551_v36 = vpack.c.bf16 %v93_v25, %v91_v24  ;;  %v553_v46 = vpack.c.bf16 %v92_v27, %v90_v26 }
  0x3d   :  { %542 = vmatpush1.bf16.msra.mxu0 %v541_v14  ;;  %v567_v32 = vpack.c.bf16 %v194_v29, %v192_v28  ;;  %v193_v33 = vld [vmem:[#allocation4 + $0x10] sm:$0xff]  ;;  %v196_v34 = vld [vmem:[#allocation4 + $0x28] sm:$0xff]  ;;  %v198_v35 = vld [vmem:[#allocation4 + $0x38] sm:$0xff] }
  0x3e   :  { %544 = vmatprep.subr.bf16.mxu0 %v543_v15  ;;  %v569_v37 = vpack.c.bf16 %v193_v33, %v191_v30  ;;  %v571_v38 = vpack.c.bf16 %v198_v35, %v196_v34  ;;  %v195_v39 = vld [vmem:[#allocation4 + $0x20] sm:$0xff]  ;;  %v197_v40 = vld [vmem:[#allocation4 + $0x30] sm:$0xff]  ;;  %v200_v41 = vld [vmem:[#allocation4 + $0x48] sm:$0xff] }
  0x3f   :  { %v95_v42 = vld [vmem:[#allocation2 + $0xa8] sm:$0xff]  ;;  %v97_v43 = vld [vmem:[#allocation2 + $0xb8] sm:$0xff]  ;;  %568 = vmatprep.subr.bf16.mxu1 %v567_v32  ;;  %v573_v45 = vpack.c.bf16 %v197_v40, %v195_v39  ;;  %v94_v47 = vld [vmem:[#allocation2 + $0xa0] sm:$0xff] }
  0x40   :  { %v202_v44 = vld [vmem:[#allocation4 + $0x58] sm:$0xff]  ;;  %570 = vmatpush1.bf16.msra.mxu1 %v569_v37  ;;  %v199_v49 = vld [vmem:[#allocation4 + $0x40] sm:$0xff]  ;;  %v201_v50 = vld [vmem:[#allocation4 + $0x50] sm:$0xff]  ;;  %v555_v51 = vpack.c.bf16 %v97_v43, %v95_v42 }
  0x41   :  { %546 = vmatpush1.bf16.msra.mxu0 %v545_v20  ;;  %572 = vmatprep.subr.bf16.mxu1 %v571_v38  ;;  %v575_v48 = vpack.c.bf16 %v202_v44, %v200_v41  ;;  %v96_v52 = vld [vmem:[#allocation2 + $0xb0] sm:$0xff]  ;;  %v204_v53 = vld [vmem:[#allocation4 + $0x68] sm:$0xff]  ;;  %v206_v54 = vld [vmem:[#allocation4 + $0x78] sm:$0xff]  ;;  %v577_v57 = vpack.c.bf16 %v201_v50, %v199_v49 }
  0x42   :  { %548 = vmatprep.subr.bf16.mxu0 %v547_v21  ;;  %v99_v55 = vld [vmem:[#allocation2 + $0xc8] sm:$0xff]  ;;  %v101_v56 = vld [vmem:[#allocation2 + $0xd8] sm:$0xff]  ;;  %v557_v58 = vpack.c.bf16 %v96_v52, %v94_v47  ;;  %v98_v59 = vld [vmem:[#allocation2 + $0xc0] sm:$0xff]  ;;  %v579_v60 = vpack.c.bf16 %v206_v54, %v204_v53 }
  0x43   :  { %v203_v61 = vld [vmem:[#allocation4 + $0x60] sm:$0xff]  ;;  %v205_v62 = vld [vmem:[#allocation4 + $0x70] sm:$0xff]  ;;  %v559_v63 = vpack.c.bf16 %v101_v56, %v99_v55  ;;  %v208_v1 = vld [vmem:[#allocation4 + $0x88] sm:$0xff] }
  0x44   :  { %574 = vmatpush1.bf16.msra.mxu1 %v573_v45  ;;  %v100_v0 = vld [vmem:[#allocation2 + $0xd0] sm:$0xff]  ;;  %v210_v2 = vld [vmem:[#allocation4 + $0x98] sm:$0xff]  ;;  %v103_v3 = vld [vmem:[#allocation2 + $0xe8] sm:$0xff]  ;;  %v581_v5 = vpack.c.bf16 %v205_v62, %v203_v61 }
  0x45   :  { %550 = vmatpush1.bf16.msra.mxu0 %v549_v31  ;;  %576 = vmatprep.subr.bf16.mxu1 %v575_v48  ;;  %v105_v4 = vld [vmem:[#allocation2 + $0xf8] sm:$0xff]  ;;  %v561_v6 = vpack.c.bf16 %v100_v0, %v98_v59  ;;  %v102_v7 = vld [vmem:[#allocation2 + $0xe0] sm:$0xff]  ;;  %v583_v8 = vpack.c.bf16 %v210_v2, %v208_v1  ;;  %v209_v10 = vld [vmem:[#allocation4 + $0x90] sm:$0xff] }
  0x46   :  { %552 = vmatprep.subr.bf16.mxu0 %v551_v36  ;;  %v207_v9 = vld [vmem:[#allocation4 + $0x80] sm:$0xff]  ;;  %v563_v11 = vpack.c.bf16 %v105_v4, %v103_v3  ;;  %v104_v12 = vld [vmem:[#allocation2 + $0xf0] sm:$0xff]  ;;  %v212_v13 = vld [vmem:[#allocation4 + $0xa8] sm:$0xff] }
  0x47   :  { %v214_v14 = vld [vmem:[#allocation4 + $0xb8] sm:$0xff]  ;;  %v585_v15 = vpack.c.bf16 %v209_v10, %v207_v9  ;;  %v565_v16 = vpack.c.bf16 %v104_v12, %v102_v7  ;;  %v211_v18 = vld [vmem:[#allocation4 + $0xa0] sm:$0xff]  ;;  %v213_v19 = vld [vmem:[#allocation4 + $0xb0] sm:$0xff] }
  0x48   :  { %578 = vmatpush1.bf16.msra.mxu1 %v577_v57  ;;  %v587_v17 = vpack.c.bf16 %v214_v14, %v212_v13  ;;  %v216_v20 = vld [vmem:[#allocation4 + $0xc8] sm:$0xff]  ;;  %v218_v21 = vld [vmem:[#allocation4 + $0xd8] sm:$0xff]  ;;  %v589_v22 = vpack.c.bf16 %v213_v19, %v211_v18  ;;  %v73_v23 = vld [vmem:[%s925_s0] sm:$0xff] }
  0x49   :  { %554 = vmatpush1.bf16.msra.mxu0 %v553_v46  ;;  %580 = vmatprep.subr.bf16.mxu1 %v579_v60  ;;  %v591_v24 = vpack.c.bf16 %v218_v21, %v216_v20  ;;  %v215_v25 = vld [vmem:[#allocation4 + $0xc0] sm:$0xff]  ;;  %v217_v26 = vld [vmem:[#allocation4 + $0xd0] sm:$0xff]  ;;  %v220_v27 = vld [vmem:[#allocation4 + $0xe8] sm:$0xff] }
  0x4a   :  { %556 = vmatprep.subr.bf16.mxu0 %v555_v51  ;;  %v222_v28 = vld [vmem:[#allocation4 + $0xf8] sm:$0xff]  ;;  %v593_v29 = vpack.c.bf16 %v217_v26, %v215_v25  ;;  %v219_v31 = vld [vmem:[#allocation4 + $0xe0] sm:$0xff]  ;;  %v221_v32 = vld [vmem:[#allocation4 + $0xf0] sm:$0xff] }
  0x4b   :  { %v595_v30 = vpack.c.bf16 %v222_v28, %v220_v27  ;;  %v224_v33 = vld [vmem:[#allocation4 + $0x108] sm:$0xff]  ;;  %v226_v34 = vld [vmem:[#allocation4 + $0x118] sm:$0xff]  ;;  %v597_v35 = vpack.c.bf16 %v221_v32, %v219_v31  ;;  %v223_v37 = vld [vmem:[#allocation4 + $0x100] sm:$0xff] }
  0x4c   :  { %582 = vmatpush1.bf16.msra.mxu1 %v581_v5  ;;  %v599_v36 = vpack.c.bf16 %v226_v34, %v224_v33  ;;  %v225_v38 = vld [vmem:[#allocation4 + $0x110] sm:$0xff]  ;;  %v228_v39 = vld [vmem:[#allocation4 + $0x128] sm:$0xff]  ;;  %v230_v40 = vld [vmem:[#allocation4 + $0x138] sm:$0xff] }
  0x4d   :  { %558 = vmatpush1.bf16.msra.mxu0 %v557_v58  ;;  %584 = vmatprep.subr.bf16.mxu1 %v583_v8  ;;  %v601_v41 = vpack.c.bf16 %v225_v38, %v223_v37  ;;  %v603_v42 = vpack.c.bf16 %v230_v40, %v228_v39  ;;  %v227_v43 = vld [vmem:[#allocation4 + $0x120] sm:$0xff]  ;;  %v229_v44 = vld [vmem:[#allocation4 + $0x130] sm:$0xff]  ;;  %v232_v45 = vld [vmem:[#allocation4 + $0x148] sm:$0xff] }
  0x4e   :  { %560 = vmatprep.subr.bf16.mxu0 %v559_v63  ;;  %v234_v46 = vld [vmem:[#allocation4 + $0x158] sm:$0xff]  ;;  %v605_v47 = vpack.c.bf16 %v229_v44, %v227_v43  ;;  %v231_v49 = vld [vmem:[#allocation4 + $0x140] sm:$0xff]  ;;  %v233_v50 = vld [vmem:[#allocation4 + $0x150] sm:$0xff] }
  0x4f   :  { %v607_v48 = vpack.c.bf16 %v234_v46, %v232_v45  ;;  %v236_v51 = vld [vmem:[#allocation4 + $0x168] sm:$0xff]  ;;  %v238_v52 = vld [vmem:[#allocation4 + $0x178] sm:$0xff]  ;;  %v609_v53 = vpack.c.bf16 %v233_v50, %v231_v49  ;;  %v235_v55 = vld [vmem:[#allocation4 + $0x160] sm:$0xff] }
  0x50   :  { %586 = vmatpush1.bf16.msra.mxu1 %v585_v15  ;;  %v611_v54 = vpack.c.bf16 %v238_v52, %v236_v51  ;;  %v237_v56 = vld [vmem:[#allocation4 + $0x170] sm:$0xff]  ;;  %v240_v57 = vld [vmem:[#allocation4 + $0x188] sm:$0xff]  ;;  %v242_v58 = vld [vmem:[#allocation4 + $0x198] sm:$0xff] }
  0x51   :  { %562 = vmatpush1.bf16.msra.mxu0 %v561_v6  ;;  %588 = vmatprep.subr.bf16.mxu1 %v587_v17  ;;  %v613_v59 = vpack.c.bf16 %v237_v56, %v235_v55  ;;  %v615_v60 = vpack.c.bf16 %v242_v58, %v240_v57  ;;  %v239_v61 = vld [vmem:[#allocation4 + $0x180] sm:$0xff]  ;;  %v241_v62 = vld [vmem:[#allocation4 + $0x190] sm:$0xff]  ;;  %v244_v63 = vld [vmem:[#allocation4 + $0x1a8] sm:$0xff] }
  0x52   :  { %564 = vmatprep.subr.bf16.mxu0 %v563_v11  ;;  %v246_v0 = vld [vmem:[#allocation4 + $0x1b8] sm:$0xff]  ;;  %v617_v1 = vpack.c.bf16 %v241_v62, %v239_v61  ;;  %v243_v3 = vld [vmem:[#allocation4 + $0x1a0] sm:$0xff]  ;;  %v245_v4 = vld [vmem:[#allocation4 + $0x1b0] sm:$0xff] }
  0x53   :  { %v619_v2 = vpack.c.bf16 %v246_v0, %v244_v63  ;;  %v248_v5 = vld [vmem:[#allocation4 + $0x1c8] sm:$0xff]  ;;  %v250_v6 = vld [vmem:[#allocation4 + $0x1d8] sm:$0xff]  ;;  %v621_v7 = vpack.c.bf16 %v245_v4, %v243_v3  ;;  %v247_v9 = vld [vmem:[#allocation4 + $0x1c0] sm:$0xff] }
  0x54   :  { %590 = vmatpush1.bf16.msra.mxu1 %v589_v22  ;;  %v623_v8 = vpack.c.bf16 %v250_v6, %v248_v5  ;;  %v249_v10 = vld [vmem:[#allocation4 + $0x1d0] sm:$0xff]  ;;  %v252_v12 = vld [vmem:[#allocation4 + $0x1e8] sm:$0xff]  ;;  %v254_v13 = vld [vmem:[#allocation4 + $0x1f8] sm:$0xff] }
  0x55   :  { %566 = vmatpush1.bf16.msra.mxu0 %v565_v16  ;;  %592 = vmatprep.subr.bf16.mxu1 %v591_v24  ;;  %v625_v11 = vpack.c.bf16 %v249_v10, %v247_v9  ;;  %v627_v14 = vpack.c.bf16 %v254_v13, %v252_v12  ;;  %v251_v15 = vld [vmem:[#allocation4 + $0x1e0] sm:$0xff]  ;;  %v253_v16 = vld [vmem:[#allocation4 + $0x1f0] sm:$0xff]  ;;  %v341_v18 = vld [vmem:[#allocation6 + $0x8] sm:$0xff] }
  0x56   :  { %v629_v17 = vpack.c.bf16 %v253_v16, %v251_v15  ;;  %v343_v19 = vld [vmem:[#allocation6 + $0x18] sm:$0xff]  ;;  %v340_v20 = vld [vmem:[#allocation6] sm:$0xff]  ;;  %v342_v22 = vld [vmem:[#allocation6 + $0x10] sm:$0xff] }
  0x57   :  { %v631_v21 = vpack.c.bf16 %v343_v19, %v341_v18  ;;  %v347_v24 = vld [vmem:[#allocation6 + $0x38] sm:$0xff]  ;;  %v633_v25 = vpack.c.bf16 %v342_v22, %v340_v20  ;;  %v344_v27 = vld [vmem:[#allocation6 + $0x20] sm:$0xff]  ;;  %v346_v28 = vld [vmem:[#allocation6 + $0x30] sm:$0xff] }
  0x58   :  { %183 = vmatmul.mubr.f32.vlgmr.msra.gmra.mrb[0].mxu0 %v73_v23  ;;  %594 = vmatpush1.bf16.msra.mxu1 %v593_v29  ;;  %v345_v23 = vld [vmem:[#allocation6 + $0x28] sm:$0xff]  ;;  %v637_v31 = vpack.c.bf16 %v346_v28, %v344_v27  ;;  %v348_v33 = vld [vmem:[#allocation6 + $0x40] sm:$0xff]  ;;  %v350_v34 = vld [vmem:[#allocation6 + $0x50] sm:$0xff] }
  0x59   :  { %596 = vmatprep.subr.bf16.mxu1 %v595_v30  ;;  %v635_v26 = vpack.c.bf16 %v347_v24, %v345_v23  ;;  %v349_v29 = vld [vmem:[#allocation6 + $0x48] sm:$0xff]  ;;  %632 = vmatprep.subr.bf16.mxu0 %v631_v21  ;;  %v351_v30 = vld [vmem:[#allocation6 + $0x58] sm:$0xff]  ;;  %v641_v37 = vpack.c.bf16 %v350_v34, %v348_v33  ;;  %v352_v39 = vld [vmem:[#allocation6 + $0x60] sm:$0xff] }
  0x5a   :  { %634 = vmatpush1.bf16.msra.mxu0 %v633_v25  ;;  %v639_v32 = vpack.c.bf16 %v351_v30, %v349_v29  ;;  %v354_v40 = vld [vmem:[#allocation6 + $0x70] sm:$0xff]  ;;  %v356_v45 = vld [vmem:[#allocation6 + $0x80] sm:$0xff]  ;;  %v381_v13 = vld [vmem:[#allocation6 + $0x148] sm:$0xff] }
  0x5b   :  { %636 = vmatprep.subr.bf16.mxu0 %v635_v26  ;;  %v645_v43 = vpack.c.bf16 %v354_v40, %v352_v39  ;;  %v358_v46 = vld [vmem:[#allocation6 + $0x90] sm:$0xff]  ;;  %v360_v51 = vld [vmem:[#allocation6 + $0xa0] sm:$0xff]  ;;  %v385_v19 = vld [vmem:[#allocation6 + $0x168] sm:$0xff] }
  0x5c   :  { %598 = vmatpush1.bf16.msra.mxu1 %v597_v35  ;;  %v353_v35 = vld [vmem:[#allocation6 + $0x68] sm:$0xff]  ;;  %v649_v49 = vpack.c.bf16 %v358_v46, %v356_v45  ;;  %v362_v52 = vld [vmem:[#allocation6 + $0xb0] sm:$0xff]  ;;  %v364_v57 = vld [vmem:[#allocation6 + $0xc0] sm:$0xff] }
  0x5d   :  { %600 = vmatprep.subr.bf16.mxu1 %v599_v36  ;;  %v355_v36 = vld [vmem:[#allocation6 + $0x78] sm:$0xff]  ;;  %v653_v55 = vpack.c.bf16 %v362_v52, %v360_v51  ;;  %v366_v58 = vld [vmem:[#allocation6 + $0xd0] sm:$0xff]  ;;  %v368_v63 = vld [vmem:[#allocation6 + $0xe0] sm:$0xff] }
  0x5e   :  { %638 = vmatpush1.bf16.msra.mxu0 %v637_v31  ;;  %v643_v38 = vpack.c.bf16 %v355_v36, %v353_v35  ;;  %v657_v61 = vpack.c.bf16 %v366_v58, %v364_v57  ;;  %v370_v0 = vld [vmem:[#allocation6 + $0xf0] sm:$0xff]  ;;  %v372_v5 = vld [vmem:[#allocation6 + $0x100] sm:$0xff]  ;;  %v387_v20 = vld [vmem:[#allocation6 + $0x178] sm:$0xff] }
  0x5f   :  { %640 = vmatprep.subr.bf16.mxu0 %v639_v32  ;;  %v661_v3 = vpack.c.bf16 %v370_v0, %v368_v63  ;;  %v374_v6 = vld [vmem:[#allocation6 + $0x110] sm:$0xff]  ;;  %v675_v22 = vpack.c.bf16 %v387_v20, %v385_v19  ;;  %v384_v23 = vld [vmem:[#allocation6 + $0x160] sm:$0xff]  ;;  %v389_v25 = vld [vmem:[#allocation6 + $0x188] sm:$0xff] }
  0x60   :  { %602 = vmatpush1.bf16.msra.mxu1 %v601_v41  ;;  %v357_v41 = vld [vmem:[#allocation6 + $0x88] sm:$0xff]  ;;  %v665_v9 = vpack.c.bf16 %v374_v6, %v372_v5  ;;  %v378_v12 = vld [vmem:[#allocation6 + $0x130] sm:$0xff]  ;;  %v391_v26 = vld [vmem:[#allocation6 + $0x198] sm:$0xff] }
  0x61   :  { %604 = vmatprep.subr.bf16.mxu1 %v603_v42  ;;  %v359_v42 = vld [vmem:[#allocation6 + $0x98] sm:$0xff]  ;;  %v382_v18 = vld [vmem:[#allocation6 + $0x150] sm:$0xff]  ;;  %v679_v28 = vpack.c.bf16 %v391_v26, %v389_v25  ;;  %v388_v29 = vld [vmem:[#allocation6 + $0x180] sm:$0xff] }
  0x62   :  { %642 = vmatpush1.bf16.msra.mxu0 %v641_v37  ;;  %v647_v44 = vpack.c.bf16 %v359_v42, %v357_v41  ;;  %v386_v24 = vld [vmem:[#allocation6 + $0x170] sm:$0xff]  ;;  %v393_v31 = vld [vmem:[#allocation6 + $0x1a8] sm:$0xff]  ;;  %v395_v32 = vld [vmem:[#allocation6 + $0x1b8] sm:$0xff]  ;;  %v108_v41 = vlaneseq }
  0x63   :  { %644 = vmatprep.subr.bf16.mxu0 %v643_v38  ;;  %v677_v27 = vpack.c.bf16 %v386_v24, %v384_v23  ;;  %v390_v30 = vld [vmem:[#allocation6 + $0x190] sm:$0xff]  ;;  %v683_v34 = vpack.c.bf16 %v395_v32, %v393_v31  ;;  %v392_v35 = vld [vmem:[#allocation6 + $0x1a0] sm:$0xff]  ;;  %v397_v37 = vld [vmem:[#allocation6 + $0x1c8] sm:$0xff] }
  0x64   :  { %606 = vmatpush1.bf16.msra.mxu1 %v605_v47  ;;  %v361_v47 = vld [vmem:[#allocation6 + $0xa8] sm:$0xff]  ;;  %v681_v33 = vpack.c.bf16 %v390_v30, %v388_v29  ;;  %v394_v36 = vld [vmem:[#allocation6 + $0x1b0] sm:$0xff]  ;;  %v399_v38 = vld [vmem:[#allocation6 + $0x1d8] sm:$0xff]  ;;  %v109_v42 = vshrl.u32 %v108_v41, 7 }
  0x65   :  { %608 = vmatprep.subr.bf16.mxu1 %v607_v48  ;;  %v363_v48 = vld [vmem:[#allocation6 + $0xb8] sm:$0xff]  ;;  %v685_v39 = vpack.c.bf16 %v394_v36, %v392_v35  ;;  %v687_v40 = vpack.c.bf16 %v399_v38, %v397_v37  ;;  %v401_v57 = vld [vmem:[#allocation6 + $0x1e8] sm:$0xff]  ;;  %v255_v63 = vld [vmem:[%s929_s4] sm:$0x3] }
  0x66   :  { %646 = vmatpush1.bf16.msra.mxu0 %v645_v43  ;;  %v651_v50 = vpack.c.bf16 %v363_v48, %v361_v47  ;;  %v890_v43 = vsub.s32 0, %v109_v42  ;;  %v895_v45 = vsub.s32 1, %v109_v42  ;;  %v403_v58 = vld [vmem:[#allocation6 + $0x1f8] sm:$0xff]  ;;  %v497_v23 = vld [vmem:[%s932_s7] sm:$0x3] }
  0x67   :  { %648 = vmatprep.subr.bf16.mxu0 %v647_v44  ;;  %v106_v44 = vld [vmem:[%s927_s2] sm:$0x3] }
  0x68   :  { %610 = vmatpush1.bf16.msra.mxu1 %v609_v53  ;;  %v365_v53 = vld [vmem:[#allocation6 + $0xc8] sm:$0xff]  ;;  %v111_v46 = vrot.slane %v106_v44, %v890_v43  ;;  %v115_v47 = vrot.slane %v106_v44, %v895_v45  ;;  %v260_v0 = vrot.slane %v255_v63, %v890_v43  ;;  %v511_v24 = vld [vmem:[%s933_s8] sm:$0x3]  ;;  %v502_v25 = vrot.slane %v497_v23, %v890_v43 }
  0x69   :  { %612 = vmatprep.subr.bf16.mxu1 %v611_v54  ;;  %v367_v54 = vld [vmem:[#allocation6 + $0xd8] sm:$0xff]  ;;  %v516_v26 = vrot.slane %v511_v24, %v890_v43 }
  0x6a   :  { %650 = vmatpush1.bf16.msra.mxu0 %v649_v49  ;;  %v655_v56 = vpack.c.bf16 %v367_v54, %v365_v53  ;;  %v396_v54 = vld [vmem:[#allocation6 + $0x1c0] sm:$0xff] }
  0x6b   :  { %652 = vmatprep.subr.bf16.mxu0 %v651_v50 }
  0x6c   :  { %614 = vmatpush1.bf16.msra.mxu1 %v613_v59  ;;  %v369_v59 = vld [vmem:[#allocation6 + $0xe8] sm:$0xff] }
  0x6d   :  { %616 = vmatprep.subr.bf16.mxu1 %v615_v60  ;;  %v371_v60 = vld [vmem:[#allocation6 + $0xf8] sm:$0xff] }
  0x6e   :  { %654 = vmatpush1.bf16.msra.mxu0 %v653_v55  ;;  %v659_v62 = vpack.c.bf16 %v371_v60, %v369_v59  ;;  %v398_v55 = vld [vmem:[#allocation6 + $0x1d0] sm:$0xff]  ;;  %v691_v59 = vpack.c.bf16 %v403_v58, %v401_v57  ;;  %v400_v60 = vld [vmem:[#allocation6 + $0x1e0] sm:$0xff] }
  0x6f   :  { %656 = vmatprep.subr.bf16.mxu0 %v655_v56  ;;  %v689_v56 = vpack.c.bf16 %v398_v55, %v396_v54 }
  0x70   :  { %618 = vmatpush1.bf16.msra.mxu1 %v617_v1  ;;  %v373_v1 = vld [vmem:[#allocation6 + $0x108] sm:$0xff] }
  0x71   :  { %620 = vmatprep.subr.bf16.mxu1 %v619_v2  ;;  %v375_v2 = vld [vmem:[#allocation6 + $0x118] sm:$0xff] }
  0x72   :  { %658 = vmatpush1.bf16.msra.mxu0 %v657_v61  ;;  %v663_v4 = vpack.c.bf16 %v375_v2, %v373_v1  ;;  %v402_v61 = vld [vmem:[#allocation6 + $0x1f0] sm:$0xff]  ;;  %v264_v1 = vrot.slane %v255_v63, %v895_v45 }
  0x73   :  { %660 = vmatprep.subr.bf16.mxu0 %v659_v62  ;;  %v693_v62 = vpack.c.bf16 %v402_v61, %v400_v60 }
  0x74   :  { %622 = vmatpush1.bf16.msra.mxu1 %v621_v7  ;;  %v377_v7 = vld [vmem:[#allocation6 + $0x128] sm:$0xff] }
  0x75   :  { %624 = vmatprep.subr.bf16.mxu1 %v623_v8  ;;  %v379_v8 = vld [vmem:[#allocation6 + $0x138] sm:$0xff] }
  0x76   :  { %662 = vmatpush1.bf16.msra.mxu0 %v661_v3  ;;  %v667_v10 = vpack.c.bf16 %v379_v8, %v377_v7  ;;  %v404_v8 = vld [vmem:[%s931_s6] sm:$0x3] }
  0x77   :  { %664 = vmatprep.subr.bf16.mxu0 %v663_v4 }
  0x78   :  { %626 = vmatpush1.bf16.msra.mxu1 %v625_v11  ;;  %v376_v11 = vld [vmem:[#allocation6 + $0x120] sm:$0xff] }
  0x79   :  { %628 = vmatprep.subr.bf16.mxu1 %v627_v14  ;;  %v383_v14 = vld [vmem:[#allocation6 + $0x158] sm:$0xff]  ;;  %v669_v15 = vpack.c.bf16 %v378_v12, %v376_v11 }
  0x7a   :  { %666 = vmatpush1.bf16.msra.mxu0 %v665_v9  ;;  %v671_v16 = vpack.c.bf16 %v383_v14, %v381_v13  ;;  %v409_v9 = vrot.slane %v404_v8, %v890_v43 }
  0x7b   :  { %668 = vmatprep.subr.bf16.mxu0 %v667_v10  ;;  %v413_v10 = vrot.slane %v404_v8, %v895_v45 }
  0x7c   :  { %630 = vmatpush1.bf16.msra.mxu1 %v629_v17  ;;  %v380_v17 = vld [vmem:[#allocation6 + $0x140] sm:$0xff] }
  0x7d   :  { %v673_v21 = vpack.c.bf16 %v382_v18, %v380_v17 }
  0x7e   :  { %670 = vmatpush1.bf16.msra.mxu0 %v669_v15 }
  0x7f   :  { %672 = vmatprep.subr.bf16.mxu0 %v671_v16 }
  0x82   :  { %674 = vmatpush1.bf16.msra.mxu0 %v673_v21 }
  0x83   :  { %676 = vmatprep.subr.bf16.mxu0 %v675_v22 }
  0x86   :  { %678 = vmatpush1.bf16.msra.mxu0 %v677_v27  ;;  %v506_v27 = vrot.slane %v497_v23, %v895_v45 }
  0x87   :  { %680 = vmatprep.subr.bf16.mxu0 %v679_v28  ;;  %v520_v28 = vrot.slane %v511_v24, %v895_v45 }
  0x8a   :  { %682 = vmatpush1.bf16.msra.mxu0 %v681_v33 }
  0x8b   :  { %684 = vmatprep.subr.bf16.mxu0 %v683_v34 }
  0x8e   :  { %686 = vmatpush1.bf16.msra.mxu0 %v685_v39 }
  0x8f   :  { %688 = vmatprep.subr.bf16.mxu0 %v687_v40 }
  0x92   :  { %690 = vmatpush1.bf16.msra.mxu0 %v689_v56 }
  0x93   :  { %692 = vmatprep.subr.bf16.mxu0 %v691_v59 }
  0x96   :  { %694 = vmatpush1.bf16.msra.mxu0 %v693_v62 }
 0x12b   :  { %v184_v48 = vpop.f32.mrb[0].mxu0 }
 0x12c   :  { %v185_v49 = vadd.f32 %v184_v48, %v111_v46  ;;  %v186_v50 = vpop.f32.mrb[1].mxu0 }
 0x12d   :  { %v187_v51 = vadd.f32 %v186_v50, %v115_v47 }
 0x12e   :  { %v189_v53 = vmax.f32 %v185_v49, 0.0 }
 0x12f   :  { %v190_v52 = vmax.f32 %v187_v51, 0.0 }
 0x131   :  { %331 = vmatprep.mubr.f32.mxu1 %v190_v52 }
 0x132   :  { %332 = vmatmul.mubr.f32.vlgmr.msra.gmra.mrb[0].mxu1 %v189_v53 }
 0x205   :  { %v333_v2 = vpop.f32.mrb[0].mxu1 }
 0x206   :  { %v334_v3 = vadd.f32 %v333_v2, %v260_v0  ;;  %v335_v4 = vpop.f32.mrb[1].mxu1 }
 0x207   :  { %v336_v5 = vadd.f32 %v335_v4, %v264_v1 }
 0x208   :  { %v338_v7 = vmax.f32 %v334_v3, 0.0 }
 0x209   :  { %v339_v6 = vmax.f32 %v336_v5, 0.0 }
 0x20b   :  { %480 = vmatprep.mubr.f32.mxu0 %v339_v6 }
 0x20c   :  { %481 = vmatmul.mubr.f32.vlgmr.msra.gmra.mrb[2].mxu0 %v338_v7 }
 0x2df   :  { %v482_v11 = vpop.f32.mrb[2].mxu0 }
 0x2e0   :  { %v483_v12 = vadd.f32 %v482_v11, %v409_v9  ;;  %v484_v13 = vpop.f32.mrb[3].mxu0 }
 0x2e1   :  { %v485_v14 = vadd.f32 %v484_v13, %v413_v10 }
 0x2e2   :  { %701 = vtanh.f32 %v483_v12  ;;  %v509_v31 = vmul.f32 %v502_v25, %v483_v12 }
 0x2e3   :  { %703 = vtanh.f32 %v485_v14  ;;  %v510_v33 = vmul.f32 %v506_v27, %v485_v14 }
 0x2ec   :  { %v702_v15 = vpop.eup %701 }
 0x2ed   :  { %v704_v16 = vpop.eup %703  ;;  %v489_v17 = vmul.f32 6.0, %v702_v15 }
 0x2ee   :  { %v490_v18 = vmul.f32 6.0, %v704_v16 }
 0x2ef   :  { %v491_v19 = vadd.f32 -4.0, %v489_v17 }
 0x2f0   :  { %v492_v20 = vadd.f32 -4.0, %v490_v18 }
 0x2f1   :  { %v493_v21 = vmul.f32 1.442695, %v491_v19 }
 0x2f2   :  { %v495_v22 = vmul.f32 1.442695, %v492_v20 }
 0x2f3   :  { %705 = vpow2.f32 %v493_v21 }
 0x2f4   :  { %707 = vpow2.f32 %v495_v22 }
 0x2fd   :  { %v706_v29 = vpop.eup %705 }
 0x2fe   :  { %v708_v30 = vpop.eup %707  ;;  %v523_v32 = vmul.f32 %v706_v29, %v516_v26 }
 0x2ff   :  { %v524_v34 = vmul.f32 %v708_v30, %v520_v28 }
 0x300   :  { %v525_v35 = vadd.f32 %v523_v32, %v509_v31 }
 0x301   :  { %v526_v36 = vadd.f32 %v524_v34, %v510_v33 }
 0x302   :  { %527 = vst [vmem:[%s934_s9] sm:$0xff] %v525_v35 }
 0x303   :  { %528 = vst [vmem:[%s934_s9 + $0x8] sm:$0xff] %v526_v36 }
 0x304   :  { %533 = vsyncpa [#allocation3], 1 }
 0x305   :  { %534 = vsyncpa [#allocation5], 1 }

</bundles_post_ra>
